<compile_context>
chip_gen: v6e
topology: v6e:2x2x1
jax: 0.10.0
libtpu: 0.0.40
codegen_flags: <defaults>
</compile_context>

<pallas_src>
import functools

import jax
import jax.numpy as jnp
import numpy as np
from jax.experimental import pallas as pl
from jax.experimental.pallas import tpu as pltpu


def _round_up(x, m):
    return (x + m - 1) // m * m


def _cdiv(a, b):
    return -(-a // b)


def _vmem_limit_bytes():
    # Generation-aware VMEM limit: ~3/4 of physical capacity, capped.
    # v5e/v6e (128 MiB) -> 96 MiB; v7x (64 MiB) -> 48 MiB.
    try:
        cap = int(pltpu.get_tpu_info().vmem_capacity_bytes)
    except Exception:
        cap = 64 * 1024 * 1024
    return min((cap * 3) // 4, 96 * 1024 * 1024)


def _choose_row_tiling(n, tm_max):
    """Row tile TM (multiple of 16) with minimal padding; >= 2 row tiles so
    the 'parallel' row axis can shard across v7x's 2 TensorCores."""
    n_tiles = max(_cdiv(n, tm_max), 1)
    if n > 16 and n_tiles < 2:
        n_tiles = 2
    tm = _round_up(_cdiv(n, n_tiles), 16)
    n_rows = _round_up(n, tm)
    return tm, n_rows


def _choose_col_tiling(n, tn_max):
    """Contraction tile TN (multiple of 128) with minimal column padding."""
    nc_min = _round_up(n, 128)
    n_tiles = max(_cdiv(nc_min, tn_max), 1)
    tn = _round_up(_cdiv(nc_min, n_tiles), 128)
    n_cols = tn * n_tiles
    return tn, n_cols


def prepare_adjacency(adjs, *, tm_max=512, tn_max=1024):
    """One-time (hoisted) pad + bf16 cast of the dense normalized adjacencies.

    adjs: (K, N, N) f32. Returns {'adjs_p': (K, n_rows, n_cols) bf16,
    'tm': int, 'tn': int}. Padded rows/cols are zero."""
    K, N, _ = adjs.shape
    tm, n_rows = _choose_row_tiling(N, tm_max)
    tn, n_cols = _choose_col_tiling(N, tn_max)
    adjs_p = jnp.zeros((K, n_rows, n_cols), jnp.bfloat16)
    adjs_p = adjs_p.at[:, :N, :N].set(adjs.astype(jnp.bfloat16))
    return {"adjs_p": jax.block_until_ready(adjs_p), "tm": tm, "tn": tn}


# ---------------------------------------------------------------------------
# Kernel: fused graph propagation + per-relation dense layer + LeakyReLU +
#         affine output, accumulated over K relations and contraction tiles.
# grid = (row_tiles, K, col_tiles): rows "parallel", (k, n) "arbitrary".
# ---------------------------------------------------------------------------
def _gcmc_logits_kernel(a_ref, e_ref, w_ref, b_ref, wafft_ref, baff_ref,
                        out_ref, ae_acc_ref):
    # NOTE: correctness of the out_ref / ae_acc_ref accumulation REQUIRES
    # (k, n) to be the trailing, sequentially-iterated ("arbitrary") grid
    # axes with the output block index independent of them. Do not reorder.
    k = pl.program_id(1)
    n = pl.program_id(2)
    last_n = pl.num_programs(2) - 1

    @pl.when(n == 0)
    def _():
        ae_acc_ref[...] = jnp.zeros_like(ae_acc_ref)

    # Partial (A_k row-tile) @ (E contraction-tile): bf16 MXU, f32 accumulate.
    ae_acc_ref[...] += jnp.dot(a_ref[0], e_ref[...],
                               preferred_element_type=jnp.float32)

    @pl.when(n == last_n)
    def _():
        # Epilogue once per (row_tile, k): tiny matmuls, bf16 MXU inputs,
        # f32 accumulation. Per-k weights are resident full-array blocks,
        # indexed dynamically with k (no per-step DMA).
        ae = ae_acc_ref[...].astype(jnp.bfloat16)           # (TM, D)
        w = w_ref[k].astype(jnp.bfloat16)                   # (D, L)
        h = jnp.dot(ae, w, preferred_element_type=jnp.float32) + b_ref[k]
        h = jnp.where(h > 0, h, 0.2 * h)                    # LeakyReLU(0.2)
        contrib = jnp.dot(h.astype(jnp.bfloat16),
                          wafft_ref[k].astype(jnp.bfloat16),
                          preferred_element_type=jnp.float32)  # (TM, D_out)

        @pl.when(k == 0)
        def _():
            out_ref[...] = baff_ref[...] + contrib

        @pl.when(k != 0)
        def _():
            out_ref[...] = out_ref[...] + contrib


def gcmc_logits(adjs_p, emb_p, weights, biases, w_aff, b_aff, *,
                n_valid, tm, tn):
    """adjs_p: (K, n_rows, n_cols) bf16 pre-padded; emb_p: (n_cols, D) bf16
    pre-padded; weights: (K, D, L); biases: (K, 1, L); w_aff: (D_out, K*L);
    b_aff: (D_out,). Returns logits (n_valid, D_out) f32."""
    K, n_rows, n_cols = adjs_p.shape
    D = emb_p.shape[1]
    L = weights.shape[2]
    D_out = w_aff.shape[0]
    assert n_rows % tm == 0 and n_cols % tn == 0

    # affine_output computes x @ W^T + b; split W^T row-blocks per relation k.
    w_aff_t = jnp.transpose(w_aff).reshape(K, L, D_out).astype(jnp.float32)
    b_aff2 = b_aff.reshape(1, D_out).astype(jnp.float32)

    grid = (n_rows // tm, K, n_cols // tn)

    logits_p = pl.pallas_call(
        _gcmc_logits_kernel,
        out_shape=jax.ShapeDtypeStruct((n_rows, D_out), jnp.float32),
        grid_spec=pltpu.PrefetchScalarGridSpec(
            num_scalar_prefetch=0,
            grid=grid,
            in_specs=[
                # A_k row/col tile: the dominant (HBM-bound) bf16 stream.
                pl.BlockSpec((1, tm, tn), lambda i, k, n: (k, i, n)),
                # E contraction tile.
                pl.BlockSpec((tn, D), lambda i, k, n: (n, 0)),
                # Tiny per-k operands: resident full-array blocks.
                pl.BlockSpec((K, D, L), lambda i, k, n: (0, 0, 0)),
                pl.BlockSpec((K, 1, L), lambda i, k, n: (0, 0, 0)),
                pl.BlockSpec((K, L, D_out), lambda i, k, n: (0, 0, 0)),
                pl.BlockSpec((1, D_out), lambda i, k, n: (0, 0)),
            ],
            out_specs=pl.BlockSpec((tm, D_out), lambda i, k, n: (i, 0)),
            scratch_shapes=[pltpu.VMEM((tm, D), jnp.float32)],
        ),
        compiler_params=pltpu.CompilerParams(
            dimension_semantics=("parallel", "arbitrary", "arbitrary"),
            vmem_limit_bytes=_vmem_limit_bytes()),
    )(adjs_p, emb_p, weights.astype(jnp.float32), biases.astype(jnp.float32),
      w_aff_t, b_aff2)

    # Padded logits rows [n_valid:] contain garbage (bias-driven); only the
    # first n_valid rows are valid. Slice before any consumer.
    return logits_p[:n_valid, :]


# ---------------------------------------------------------------------------
# Full forward (glue in plain JAX: embedding concat/pad, gathers, rating).
# ---------------------------------------------------------------------------
@functools.partial(jax.jit, static_argnames=("n_users", "tm", "tn"))
def gcmc_forward(users, items, params, adjs_p, *, n_users, tm, tn):
    E = jnp.concatenate([params["user_emb"], params["item_emb"]], axis=0)
    N, D = E.shape
    n_cols = adjs_p.shape[2]
    # Embedding pad/cast is O(N*D) -- negligible next to the K*N^2 adjacency
    # stream, so it stays in the per-call path (embeddings are trainable).
    emb_p = jnp.zeros((n_cols, D), jnp.bfloat16).at[:N, :].set(
        E.astype(jnp.bfloat16))
    logits = gcmc_logits(adjs_p, emb_p, params["weights"], params["biases"],
                         params["w_aff"], params["b_aff"],
                         n_valid=N, tm=tm, tn=tn)
    u_embeddings = logits[:n_users, :][users, :]
    i_embeddings = logits[n_users:, :][items, :]
    # Rating head: tiny gather * mul * row-sum; XLA fuses this fine.
    return jnp.sum(u_embeddings * i_embeddings, axis=1)


# Pure-JAX reference for validation (matching the bf16 cast of the adjacency
# / embedding stream used by the kernel).
def gcmc_reference(users, items, params, n_users, match_bf16=True):
    E = jnp.concatenate([params["user_emb"], params["item_emb"]], axis=0)
    adjs = params["adjs"]
    if match_bf16:
        E = E.astype(jnp.bfloat16).astype(jnp.float32)
        adjs = adjs.astype(jnp.bfloat16).astype(jnp.float32)
    K = adjs.shape[0]
    m_all = []
    for k in range(K):
        h = adjs[k] @ E @ params["weights"][k] + params["biases"][k]
        m_all.append(h)
    m_all = jnp.concatenate(m_all, axis=1)
    m_all = jnp.where(m_all > 0, m_all, 0.2 * m_all)
    logits = m_all @ params["w_aff"].T + params["b_aff"]
    u = logits[:n_users, :][users, :]
    i = logits[n_users:, :][items, :]
    return jnp.sum(u * i, axis=1)


def xavier_uniform(key, shape):
    fan_in, fan_out = shape[-2], shape[-1]
    bound = float(np.sqrt(6.0 / (fan_in + fan_out)))
    return jax.random.uniform(key, shape, jnp.float32, -bound, bound)


def build_params(key, n_users, n_items, embed_size, L, K):
    N = n_users + n_items
    keys = jax.random.split(key, 8)
    # Synthetic normalized adjacencies (dense stand-ins for sparse COO mats).
    adj_raw = jax.random.uniform(keys[0], (K, N, N), jnp.float32)
    adj_raw = jnp.where(adj_raw > 0.7, adj_raw, 0.0)   # sparsify
    adjs = adj_raw / (jnp.sum(adj_raw, axis=-1, keepdims=True) + 1e-6)
    return {
        "adjs": adjs,
        "user_emb": xavier_uniform(keys[1], (n_users, embed_size)),
        "item_emb": xavier_uniform(keys[2], (n_items, embed_size)),
        "weights": xavier_uniform(keys[3], (K, embed_size, L)),
        "biases": xavier_uniform(keys[4], (K, 1, L)),
        "w_aff": xavier_uniform(keys[5], (embed_size, L * K)),
        "b_aff": jax.random.uniform(keys[6], (embed_size,), jnp.float32,
                                    -0.1, 0.1),
    }


if __name__ == "__main__":
    # --- Config 1: small shapes consistent with the module. -----------------
    n_users, n_items, embed_size, L, K = 8, 16, 32, 16, 2
    params = build_params(jax.random.PRNGKey(0), n_users, n_items,
                          embed_size, L, K)
    users = jnp.array([0, 3, 5, 7], dtype=jnp.int32)
    items = jnp.array([1, 2, 4, 8], dtype=jnp.int32)

    prep = prepare_adjacency(params["adjs"])           # hoisted pad/cast
    out = gcmc_forward(users, items, params, prep["adjs_p"],
                       n_users=n_users, tm=prep["tm"], tn=prep["tn"])
    out = np.asarray(jax.block_until_ready(out))
    ref = np.asarray(jax.block_until_ready(
        gcmc_reference(users, items, params, n_users)))
    np.testing.assert_allclose(out, ref, rtol=3e-2, atol=3e-2)

    # --- Config 2: larger N, forced small tiles to exercise the full 3-D
    #     (row_tiles, K, contraction_tiles) grid. ----------------------------
    n_users2, n_items2 = 96, 224                       # N = 320
    params2 = build_params(jax.random.PRNGKey(1), n_users2, n_items2,
                           embed_size, L, K)
    users2 = jnp.arange(8, dtype=jnp.int32)
    items2 = jnp.arange(8, dtype=jnp.int32) * 3
    prep2 = prepare_adjacency(params2["adjs"], tm_max=64, tn_max=128)
    out2 = gcmc_forward(users2, items2, params2, prep2["adjs_p"],
                        n_users=n_users2, tm=prep2["tm"], tn=prep2["tn"])
    out2 = np.asarray(jax.block_until_ready(out2))
    ref2 = np.asarray(jax.block_until_ready(
        gcmc_reference(users2, items2, params2, n_users2)))
    np.testing.assert_allclose(out2, ref2, rtol=3e-2, atol=3e-2)

    print("KERNEL_OK")
</pallas_src>

<mosaic_0001>
module attributes {stable_mosaic.version = 11 : i64} {
  func.func @_gcmc_logits_kernel(%arg0: i32, %arg1: i32, %arg2: i32, %arg3: memref<1x16x128xbf16, #tpu.memory_space<vmem>>, %arg4: memref<128x32xbf16, #tpu.memory_space<vmem>>, %arg5: memref<2x32x16xf32, #tpu.memory_space<vmem>>, %arg6: memref<2x1x16xf32, #tpu.memory_space<vmem>>, %arg7: memref<2x16x32xf32, #tpu.memory_space<vmem>>, %arg8: memref<1x32xf32, #tpu.memory_space<vmem>>, %arg9: memref<16x32xf32, #tpu.memory_space<vmem>>, %arg10: memref<16x32xf32, #tpu.memory_space<vmem>>) attributes {dimension_semantics = [#tpu.dimension_semantics<parallel>, #tpu.dimension_semantics<arbitrary>, #tpu.dimension_semantics<arbitrary>], iteration_bounds = array<i64: 2, 2, 1>, scalar_prefetch = 0 : i64, scratch_operands = 1 : i64, tpu.core_type = #tpu.core_type<tc>, window_params = [{transform_indices = @transform_0, window_bounds = array<i64: 1, 16, 128>}, {transform_indices = @transform_1, window_bounds = array<i64: 128, 32>}, {pipeline_mode = #tpu.pipeline_mode<synchronous>, transform_indices = @transform_2, window_bounds = array<i64: 2, 32, 16>}, {pipeline_mode = #tpu.pipeline_mode<synchronous>, transform_indices = @transform_3, window_bounds = array<i64: 2, 1, 16>}, {pipeline_mode = #tpu.pipeline_mode<synchronous>, transform_indices = @transform_4, window_bounds = array<i64: 2, 16, 32>}, {pipeline_mode = #tpu.pipeline_mode<synchronous>, transform_indices = @transform_5, window_bounds = array<i64: 1, 32>}, {transform_indices = @transform_6, window_bounds = array<i64: 16, 32>}]} {
    %c0_i32 = arith.constant 0 : i32
    %0 = arith.cmpi eq, %arg2, %c0_i32 : i32
    %1 = arith.extui %0 : i1 to i32
    %c0_i32_0 = arith.constant 0 : i32
    %2 = arith.cmpi ne, %1, %c0_i32_0 : i32
    scf.if %2 {
      %cst_11 = arith.constant 0.000000e+00 : f32
      %13 = vector.broadcast %cst_11 : f32 to vector<16x32xf32>
      %c0_12 = arith.constant 0 : index
      %c0_13 = arith.constant 0 : index
      %14 = vector.load %arg10[%c0_12, %c0_13] : memref<16x32xf32, #tpu.memory_space<vmem>>, vector<16x32xf32>
      tpu.vector_store %arg10[%c0_12, %c0_13], %13 {strides = array<i32>} : memref<16x32xf32, #tpu.memory_space<vmem>>, vector<16x32xf32>,
    } else {
    }
    %c0 = arith.constant 0 : index
    %c0_1 = arith.constant 0 : index
    %3 = vector.load %arg10[%c0, %c0_1] : memref<16x32xf32, #tpu.memory_space<vmem>>, vector<16x32xf32>
    %c0_2 = arith.constant 0 : index
    %c0_3 = arith.constant 0 : index
    %c0_4 = arith.constant 0 : index
    %4 = vector.load %arg3[%c0_2, %c0_3, %c0_4] : memref<1x16x128xbf16, #tpu.memory_space<vmem>>, vector<1x16x128xbf16>
    %5 = vector.shape_cast %4 : vector<1x16x128xbf16> to vector<16x128xbf16>
    %c0_5 = arith.constant 0 : index
    %c0_6 = arith.constant 0 : index
    %6 = vector.load %arg4[%c0_5, %c0_6] : memref<128x32xbf16, #tpu.memory_space<vmem>>, vector<128x32xbf16>
    %cst = arith.constant dense<0.000000e+00> : vector<16x32xf32>
    %7 = tpu.matmul %5, %6, %cst {dimension_numbers = #tpu.dot_dimension_numbers<[1], [0], [0], [1], [0, 0, 1, 1], [], []>} : vector<16x128xbf16>, vector<128x32xbf16>, vector<16x32xf32> -> vector<16x32xf32>
    %8 = arith.addf %3, %7 : vector<16x32xf32>
    %c0_7 = arith.constant 0 : index
    %c0_8 = arith.constant 0 : index
    %9 = vector.load %arg10[%c0_7, %c0_8] : memref<16x32xf32, #tpu.memory_space<vmem>>, vector<16x32xf32>
    tpu.vector_store %arg10[%c0_7, %c0_8], %8 {strides = array<i32>} : memref<16x32xf32, #tpu.memory_space<vmem>>, vector<16x32xf32>,
    %c0_i32_9 = arith.constant 0 : i32
    %10 = arith.cmpi eq, %arg2, %c0_i32_9 : i32
    %11 = arith.extui %10 : i1 to i32
    %c0_i32_10 = arith.constant 0 : i32
    %12 = arith.cmpi ne, %11, %c0_i32_10 : i32
    scf.if %12 {
      %c0_11 = arith.constant 0 : index
      %c0_12 = arith.constant 0 : index
      %13 = vector.load %arg10[%c0_11, %c0_12] : memref<16x32xf32, #tpu.memory_space<vmem>>, vector<16x32xf32>
      %14 = arith.truncf %13 : vector<16x32xf32> to vector<16x32xbf16>
      %15 = arith.index_cast %arg1 : i32 to index
      %c0_13 = arith.constant 0 : index
      %c0_14 = arith.constant 0 : index
      %16 = vector.load %arg5[%15, %c0_13, %c0_14] : memref<2x32x16xf32, #tpu.memory_space<vmem>>, vector<1x32x16xf32>
      %17 = vector.shape_cast %16 : vector<1x32x16xf32> to vector<32x16xf32>
      %18 = arith.truncf %17 : vector<32x16xf32> to vector<32x16xbf16>
      %cst_15 = arith.constant dense<0.000000e+00> : vector<16x16xf32>
      %19 = tpu.matmul %14, %18, %cst_15 {dimension_numbers = #tpu.dot_dimension_numbers<[1], [0], [0], [1], [0, 0, 1, 1], [], []>} : vector<16x32xbf16>, vector<32x16xbf16>, vector<16x16xf32> -> vector<16x16xf32>
      %20 = arith.index_cast %arg1 : i32 to index
      %c0_16 = arith.constant 0 : index
      %c0_17 = arith.constant 0 : index
      %21 = vector.load %arg6[%20, %c0_16, %c0_17] : memref<2x1x16xf32, #tpu.memory_space<vmem>>, vector<1x1x16xf32>
      %22 = vector.shape_cast %21 : vector<1x1x16xf32> to vector<1x16xf32>
      %23 = vector.broadcast %22 : vector<1x16xf32> to vector<16x16xf32>
      %24 = arith.addf %19, %23 : vector<16x16xf32>
      %cst_18 = arith.constant 0.000000e+00 : f32
      %25 = vector.broadcast %cst_18 : f32 to vector<16x16xf32>
      %26 = arith.cmpf ogt, %24, %25 : vector<16x16xf32>
      %cst_19 = arith.constant 2.000000e-01 : f32
      %27 = vector.broadcast %cst_19 : f32 to vector<16x16xf32>
      %28 = arith.mulf %27, %24 : vector<16x16xf32>
      %29 = arith.select %26, %24, %28 : vector<16x16xi1>, vector<16x16xf32>
      %30 = arith.truncf %29 : vector<16x16xf32> to vector<16x16xbf16>
      %31 = arith.index_cast %arg1 : i32 to index
      %c0_20 = arith.constant 0 : index
      %c0_21 = arith.constant 0 : index
      %32 = vector.load %arg7[%31, %c0_20, %c0_21] : memref<2x16x32xf32, #tpu.memory_space<vmem>>, vector<1x16x32xf32>
      %33 = vector.shape_cast %32 : vector<1x16x32xf32> to vector<16x32xf32>
      %34 = arith.truncf %33 : vector<16x32xf32> to vector<16x32xbf16>
      %cst_22 = arith.constant dense<0.000000e+00> : vector<16x32xf32>
      %35 = tpu.matmul %30, %34, %cst_22 {dimension_numbers = #tpu.dot_dimension_numbers<[1], [0], [0], [1], [0, 0, 1, 1], [], []>} : vector<16x16xbf16>, vector<16x32xbf16>, vector<16x32xf32> -> vector<16x32xf32>
      %c0_i32_23 = arith.constant 0 : i32
      %36 = arith.cmpi eq, %arg1, %c0_i32_23 : i32
      %37 = arith.extui %36 : i1 to i32
      %c0_i32_24 = arith.constant 0 : i32
      %38 = arith.cmpi ne, %37, %c0_i32_24 : i32
      scf.if %38 {
        %c0_27 = arith.constant 0 : index
        %c0_28 = arith.constant 0 : index
        %42 = vector.load %arg8[%c0_27, %c0_28] : memref<1x32xf32, #tpu.memory_space<vmem>>, vector<1x32xf32>
        %43 = vector.broadcast %42 : vector<1x32xf32> to vector<16x32xf32>
        %44 = arith.addf %43, %35 : vector<16x32xf32>
        %c0_29 = arith.constant 0 : index
        %c0_30 = arith.constant 0 : index
        %45 = vector.load %arg9[%c0_29, %c0_30] : memref<16x32xf32, #tpu.memory_space<vmem>>, vector<16x32xf32>
        tpu.vector_store %arg9[%c0_29, %c0_30], %44 {strides = array<i32>} : memref<16x32xf32, #tpu.memory_space<vmem>>, vector<16x32xf32>,
      } else {
      }
      %c0_i32_25 = arith.constant 0 : i32
      %39 = arith.cmpi ne, %arg1, %c0_i32_25 : i32
      %40 = arith.extui %39 : i1 to i32
      %c0_i32_26 = arith.constant 0 : i32
      %41 = arith.cmpi ne, %40, %c0_i32_26 : i32
      scf.if %41 {
        %c0_27 = arith.constant 0 : index
        %c0_28 = arith.constant 0 : index
        %42 = vector.load %arg9[%c0_27, %c0_28] : memref<16x32xf32, #tpu.memory_space<vmem>>, vector<16x32xf32>
        %43 = arith.addf %42, %35 : vector<16x32xf32>
        %c0_29 = arith.constant 0 : index
        %c0_30 = arith.constant 0 : index
        %44 = vector.load %arg9[%c0_29, %c0_30] : memref<16x32xf32, #tpu.memory_space<vmem>>, vector<16x32xf32>
        tpu.vector_store %arg9[%c0_29, %c0_30], %43 {strides = array<i32>} : memref<16x32xf32, #tpu.memory_space<vmem>>, vector<16x32xf32>,
      } else {
      }
    } else {
    }
    return
  }
  func.func @transform_0(%arg0: i32, %arg1: i32, %arg2: i32) -> (i32, i32, i32) {
    %c0_i32 = arith.constant 0 : i32
    return %arg1, %arg0, %arg2 : i32, i32, i32
  }
  func.func @transform_1(%arg0: i32, %arg1: i32, %arg2: i32) -> (i32, i32) {
    %c0_i32 = arith.constant 0 : i32
    %c0_i32_0 = arith.constant 0 : i32
    return %arg2, %c0_i32 : i32, i32
  }
  func.func @transform_2(%arg0: i32, %arg1: i32, %arg2: i32) -> (i32, i32, i32) {
    %c0_i32 = arith.constant 0 : i32
    %c0_i32_0 = arith.constant 0 : i32
    %c0_i32_1 = arith.constant 0 : i32
    %c0_i32_2 = arith.constant 0 : i32
    return %c0_i32, %c0_i32_0, %c0_i32_1 : i32, i32, i32
  }
  func.func @transform_3(%arg0: i32, %arg1: i32, %arg2: i32) -> (i32, i32, i32) {
    %c0_i32 = arith.constant 0 : i32
    %c0_i32_0 = arith.constant 0 : i32
    %c0_i32_1 = arith.constant 0 : i32
    %c0_i32_2 = arith.constant 0 : i32
    return %c0_i32, %c0_i32_0, %c0_i32_1 : i32, i32, i32
  }
  func.func @transform_4(%arg0: i32, %arg1: i32, %arg2: i32) -> (i32, i32, i32) {
    %c0_i32 = arith.constant 0 : i32
    %c0_i32_0 = arith.constant 0 : i32
    %c0_i32_1 = arith.constant 0 : i32
    %c0_i32_2 = arith.constant 0 : i32
    return %c0_i32, %c0_i32_0, %c0_i32_1 : i32, i32, i32
  }
  func.func @transform_5(%arg0: i32, %arg1: i32, %arg2: i32) -> (i32, i32) {
    %c0_i32 = arith.constant 0 : i32
    %c0_i32_0 = arith.constant 0 : i32
    %c0_i32_1 = arith.constant 0 : i32
    return %c0_i32, %c0_i32_0 : i32, i32
  }
  func.func @transform_6(%arg0: i32, %arg1: i32, %arg2: i32) -> (i32, i32) {
    %c0_i32 = arith.constant 0 : i32
    %c0_i32_0 = arith.constant 0 : i32
    return %arg0, %c0_i32 : i32, i32
  }
}

</mosaic_0001>

<bundles_post_ra>
// kernel: gcmc_forward.1
= control target key start
LH: loop header
LB: loop body
LE: loop exit
PB: predicated region body
PF: predicated region fallthrough
CT: control target
= control target key end

     0   :  { %s903_s21 = smov 0   ;;  %s905_s22 = smov 0   ;;  %s1038_s0 = inlined_call_operand.vmem [shape: bf16[2,32,128], index: 0, kind: input, shape index: {}]   ;;  %s1039_s1 = inlined_call_operand.vmem [shape: bf16[128,32], index: 1, kind: input, shape index: {}]   ;;  %s1040_s2 = inlined_call_operand.vmem [shape: f32[2,32,16], index: 2, kind: input, shape index: {}]   ;;  %s1041_s3 = inlined_call_operand.vmem [shape: f32[2,1,16], index: 3, kind: input, shape index: {}]   ;;  %s1042_s4 = inlined_call_operand.vmem [shape: f32[2,16,32], index: 4, kind: input, shape index: {}]   ;;  %s1043_s5 = inlined_call_operand.vmem [shape: f32[1,32], index: 5, kind: input, shape index: {}]   ;;  %s1044_s6 = inlined_call_operand.vmem [shape: f32[32,32], index: 6, kind: output, shape index: {}]  }
   0x1   :  { %s907_s23 = smov 0   ;;  %s909_s24 = smov 0  }
   0x2   :  { %s911_s25 = smov 0  }
   0x3 LB: > { %s31_s26 = sadd.s32 1, %s856_s23  ;;  %s35_s27 = sadd.s32 1, %s860_s24  ;;  %s864_s25 = sphi %s911_s25, %s16_s25   ;;  %s860_s24 = sphi %s909_s24, %s1048_s24   ;;  %s856_s23 = sphi %s907_s23, %s1047_s23   ;;  %s852_s22 = sphi %s905_s22, %s1046_s22   ;;  %s848_s21 = sphi %s903_s21, %s1045_s21  }
   0x4   : > { %p33_p0 = scmp.ge.s32.totalorder %s31_s26, 2  ;;  %p702_p1 = scmp.ge.s32.totalorder %s864_s25, 1 }
   0x5   : > { %p254_p2 = scmp.lt.s32.totalorder %s864_s25, 5 }
   0x6   : > { %s1050_s26 = smov (%p33_p0, %s31_s26), 0  ;;  %s1052_s27 = smov (!%p33_p0, %s35_s27), %s860_s24 }
   0x7   : > { %p255_p3 = pnand %p702_p1, %p254_p2  ;;  %p37_p4 = scmp.ge.s32.totalorder %s1052_s27, 2 }
   0x8   : > { %s703_s8 = sshll.u32 (!%p255_p3), %s852_s22, 1  ;;  %p297_p5 = scmp.lt.s32.totalorder (!%p255_p3), %s848_s21, 1 }
   0x9   : > { %s1054_s27 = smov (%p37_p4, %s1052_s27), 0  ;;  %258 = sbr.rel (%p255_p3) target bundleno = 674 (0x2a2), region = 44 }
   0xa   : > { %p299_p6 = scmp.lt.s32.totalorder (!%p255_p3), %s703_s8, 3  ;;  %s720_s19 = sshll.u32 (!%p255_p3), %s848_s21, 4 }
   0xb   : > { %s523_s28 = scalar_lea.vmem (!%p255_p3), %s1042_s4, %s720_s19  ;;  %s463_s7 = scalar_lea.vmem (!%p255_p3), %s1041_s3, %s848_s21 }
   0xc   : > { %p722_p7 = scmp.ne.s32.totalorder (!%p255_p3), %s848_s21, 0 }
   0xe   : > { %v817_v0 = vld [vmem:[%s1039_s1 + $0x38] sm:$0xff]   ;;  %v866_v1 = vmov 0.0   ;;  %v818_v2 = vld [vmem:[%s1039_s1 + $0x30] sm:$0xff]   ;;  %vm867_vm0 = vmmov 0   ;;  %s298_s9 = scalar_select %p297_p5, %s848_s21, 1  ;;  %v819_v3 = vld [vmem:[%s1039_s1 + $0x28] sm:$0xff]  }
   0xf   : > { %741 = vmatprep.subr.bf16.mxu0 %v866_v1  ;;  %761 = vmatprep.subr.bf16.mxu1 %v866_v1  ;;  %s1056_s8 = smov (!%p299_p6, %s703_s8), 3  ;;  %vm326_vm1 = vcmask 261120   ;;  %v820_v4 = vld [vmem:[%s1039_s1 + $0x20] sm:$0xff]   ;;  %v821_v5 = vld [vmem:[%s1039_s1 + $0x18] sm:$0xff]   ;;  %v822_v6 = vld [vmem:[%s1039_s1 + $0x10] sm:$0xff]   ;;  %vm527_vm4 = vcmask 130048  }
  0x10   : > { %742 = vmatpush3.bf16.msra.mxu0 %v817_v0  ;;  %757 = vmatprep.mubr.msk.bf16.mxu0 %vm867_vm0, %v866_v1  ;;  %s704_s12 = sshll.u32 %s298_s9, 2  ;;  %s707_s14 = sshll.u32 %s1056_s8, 3  ;;  %327 = vst.msk [vmem:[#allocation2] sm:$0xff] %vm326_vm1, %v866_v1  ;;  %328 = vst.msk [vmem:[#allocation2 + $0x8] sm:$0xff] %vm326_vm1, %v866_v1  ;;  %v823_v7 = vld [vmem:[%s1039_s1 + $0x8] sm:$0xff]   ;;  %v824_v8 = vld [vmem:[%s1039_s1] sm:$0xff]  }
  0x11   : > { %743 = vmatprep.subr.bf16.mxu0 %v866_v1  ;;  %765 = vmatprep.mubr.msk.bf16.mxu1 %vm867_vm0, %v866_v1  ;;  %s305_s13 = sadd.s32 %s704_s12, %s1056_s8  ;;  %s960_s18 = scalar_lea.vmem %s1044_s6, %s707_s14  ;;  %v524_v27 = vld [vmem:[%s523_s28] sm:$0xff]  ;;  %v525_v28 = vld [vmem:[%s523_s28 + $0x8] sm:$0xff] }
  0x12   : > { %s705_s15 = sshll.u32 %s305_s13, 2  ;;  %s717_s14 = sshll.u32 %s848_s21, 5  ;;  %v526_v29 = vpack.c.bf16 %v525_v28, %v524_v27  ;;  %v718_v30 = vld [vmem:[%s463_s7] ss:$0 sm:$0xff] }
  0x13   : > { %s307_s29 = scalar_lea.vmem %s1038_s0, %s705_s15  ;;  %s456_s17 = scalar_lea.vmem %s1040_s2, %s717_s14 }
  0x14   : > { %744 = vmatpush3.bf16.msra.mxu0 %v818_v2  ;;  %v825_v9 = vld [vmem:[%s307_s29] sm:$0xff]   ;;  %v459_v10 = vld [vmem:[%s456_s17 + $0x10] sm:$0xff]  ;;  %v460_v11 = vld [vmem:[%s456_s17 + $0x18] sm:$0xff] }
  0x15   : > { %745 = vmatprep.subr.bf16.mxu0 %v866_v1  ;;  %v457_v12 = vld [vmem:[%s456_s17] sm:$0xff]  ;;  %v462_v13 = vpack.c.bf16 %v460_v11, %v459_v10  ;;  %v458_v14 = vld [vmem:[%s456_s17 + $0x8] sm:$0xff] }
  0x16   : > { %v461_v15 = vpack.c.bf16 %v458_v14, %v457_v12 }
  0x17   : > { %762 = vmatpush3.bf16.msra.mxu1 %v462_v13  ;;  %v329_v16 = vld [vmem:[#allocation2] sm:$0xff]  ;;  %v330_v20 = vld [vmem:[#allocation2 + $0x8] sm:$0xff] }
  0x18   : > { %746 = vmatpush3.bf16.msra.mxu0 %v819_v3  ;;  %763 = vmatprep.subr.bf16.mxu1 %v866_v1 }
  0x19   : > { %747 = vmatprep.subr.bf16.mxu0 %v866_v1 }
  0x1b   : > { %764 = vmatpush3.bf16.msra.mxu1 %v461_v15 }
  0x1c   : > { %748 = vmatpush3.bf16.msra.mxu0 %v820_v4  ;;  %769 = vmatprep.subr.bf16.mxu1 %v866_v1 }
  0x1d   : > { %749 = vmatprep.subr.bf16.mxu0 %v866_v1 }
  0x20   : > { %750 = vmatpush3.bf16.msra.mxu0 %v821_v5 }
  0x21   : > { %751 = vmatprep.subr.bf16.mxu0 %v866_v1 }
  0x24   : > { %752 = vmatpush3.bf16.msra.mxu0 %v822_v6 }
  0x25   : > { %753 = vmatprep.subr.bf16.mxu0 %v866_v1 }
  0x28   : > { %754 = vmatpush3.bf16.msra.mxu0 %v823_v7 }
  0x29   : > { %755 = vmatprep.subr.bf16.mxu0 %v866_v1 }
  0x2c   : > { %756 = vmatpush3.bf16.msra.mxu0 %v824_v8 }
  0x2f   : > { %758 = vmatmul.mubr.bf16.vlgmr.msra.gmra.mxu0 %v825_v9 }
  0xef   : > { %v437_v17 = vpop.f32.mrf.mxu0 }
  0xf0   : > { %v444_v18 = vadd.f32 %v437_v17, %v329_v16 }
  0xf1   : > { %v759_v19 = vpop.f32.mrf.mxu0 }
  0xf2   : > { %447 = vst.msk [vmem:[#allocation2] sm:$0xff] %vm326_vm1, %v444_v18 }
  0xf3   : > { %v440_v21 = vpop.f32.mrf.mxu0 }
  0xf4   : > { %v445_v22 = vadd.f32 %v440_v21, %v330_v20 }
  0xf5   : > { %v760_v23 = vpop.f32.mrf.mxu0 }
  0xf6   : > { %448 = vst.msk [vmem:[#allocation2 + $0x8] sm:$0xff] %vm326_vm1, %v445_v22 }
  0xf9   : > { %v452_v24 = vld [vmem:[#allocation2] sm:$0xff] }
  0xfd   : > { %v453_v25 = vld [vmem:[#allocation2 + $0x8] sm:$0xff] }
  0xfe   : > { %v454_v26 = vpack.c.bf16 %v453_v25, %v452_v24 }
 0x100   : > { %766 = vmatmul.mubr.msk.bf16.vlgmr.msra.gmra.mxu1 %vm326_vm1, %v454_v26 }
 0x101   : > { %771 = vmatprep.mubr.msk.bf16.mxu1 %vm867_vm0, %v866_v1  ;;  %770 = vmatpush3.bf16.msra.mxu1 %v526_v29 }
 0x1c0   : > { %v508_v31 = vpop.f32.mrf.mxu1 }
 0x1c1   : > { %v509_v32 = vadd.f32 %v718_v30, %v508_v31 }
 0x1c2   : > { %v767_v33 = vpop.f32.mrf.mxu1 }
 0x1c3   : > { %v517_v35 = vmul.f32 0.2, %v509_v32  ;;  %vm515_vm2 = vcmp.gt.f32.partialorder %v509_v32, 0.0 }
 0x1c4   : > { %v511_v34 = vpop.f32.mrf.mxu1 }
 0x1c5   : > { %v512_v36 = vadd.f32 %v718_v30, %v511_v34  ;;  %v519_v39 = vsel %vm515_vm2, %v509_v32, %v517_v35 }
 0x1c6   : > { %v768_v37 = vpop.f32.mrf.mxu1 }
 0x1c7   : > { %vm516_vm3 = vcmp.gt.f32.partialorder %v512_v36, 0.0  ;;  %v518_v38 = vmul.f32 0.2, %v512_v36 }
 0x1c9   : > { %v520_v40 = vsel %vm516_vm3, %v512_v36, %v518_v38 }
 0x1ca   : > { %v521_v41 = vpack.c.bf16 %v520_v40, %v519_v39 }
 0x1cc   : > { %772 = vmatmul.mubr.msk.bf16.vlgmr.msra.gmra.mxu1 %vm527_vm4, %v521_v41 }
 0x28c   : > { %v565_v42 = vpop.f32.mrf.mxu1 }
 0x28e   : > { %v773_v43 = vpop.f32.mrf.mxu1  ;;  %575 = sbr.rel (%p722_p7) target bundleno = 663 (0x297), region = 56 }
 0x290   : > { %v568_v44 = vpop.f32.mrf.mxu1 }
 0x292   : > { %v774_v45 = vpop.f32.mrf.mxu1 }
 0x293   : > { %v723_v46 = vld [vmem:[%s1043_s5] ss:$0 sm:$0xff] }
 0x294   : > { %v583_v47 = vadd.f32 %v723_v46, %v565_v42  ;;  %v584_v48 = vadd.f32 %v723_v46, %v568_v44 }
 0x296   : > { %585 = vst.msk [vmem:[%s960_s18] sm:$0xff] %vm326_vm1, %v583_v47  ;;  %586 = vst.msk [vmem:[%s960_s18 + $0x8] sm:$0xff] %vm326_vm1, %v584_v48 }
 0x297 PF: > { %p724_p8 = scmp.eq.s32.totalorder %s848_s21, 0 }
 0x299   : > { %590 = sbr.rel (%p724_p8) target bundleno = 674 (0x2a2), region = 60 }
 0x29e   : > { %v591_v49 = vld [vmem:[%s960_s18] sm:$0xff]  ;;  %v592_v50 = vld [vmem:[%s960_s18 + $0x8] sm:$0xff] }
 0x29f   : > { %v593_v51 = vadd.f32 %v591_v49, %v565_v42  ;;  %v594_v52 = vadd.f32 %v592_v50, %v568_v44 }
 0x2a1   : > { %595 = vst.msk [vmem:[%s960_s18] sm:$0xff] %vm326_vm1, %v593_v51  ;;  %596 = vst.msk [vmem:[%s960_s18 + $0x8] sm:$0xff] %vm326_vm1, %v594_v52 }
 0x2a2 PF: > { %s16_s25 = sadd.s32 1, %s864_s25   ;;  %s1045_s21 = smov %s856_s23 }
 0x2a3   : > { %p13_p9 = scmp.ge.s32.totalorder %s16_s25, 6   ;;  %s1046_s22 = smov %s860_s24 }
 0x2a4   : > { %s1047_s23 = smov %s1050_s26  ;;  %s1048_s24 = smov %s1054_s27 }
 0x2a5   :  { %15 = sbr.rel (!%p13_p9) target bundleno = 3 (0x3), region = 96 }

</bundles_post_ra>
